<compile_context>
chip_gen: v7x
topology: tpu7x:2x2x1
jax: 0.10.0
libtpu: 0.0.40
codegen_flags: <defaults>
</compile_context>

<pallas_src>
import jax
import jax.numpy as jnp
from jax.experimental import pallas as pl
from jax.experimental.pallas import tpu as pltpu


def transition_kernel(x_ref, sb_ref, wc_ref, o_ref):
    # x_ref:  (1, 4, R, W//2, Cin)  the four 2x2-pooling taps for each output position
    # sb_ref: (2, Cin)              row 0 = folded BN scale, row 1 = folded BN bias
    # wc_ref: (Cin, Cout)           1x1 conv weight (transposed); dtype picks MXU path
    # o_ref:  (1, R, W//2, Cout)
    R = o_ref.shape[1]
    Wh = o_ref.shape[2]
    scale = sb_ref[0:1, :]                      # (1, Cin)
    bias = sb_ref[1:2, :]                       # (1, Cin)

    xb = x_ref[...]                             # (1, 4, R, W//2, Cin)

    def bn_relu(v):
        # Folded BatchNorm affine + ReLU (VPU).
        return jnp.maximum(v * scale + bias, 0.0)

    # 2x2 window sum = sum of the four taps (leading-dim indexing only).
    pooled = (bn_relu(xb[0, 0]) + bn_relu(xb[0, 1])
              + bn_relu(xb[0, 2]) + bn_relu(xb[0, 3]))      # (R, W//2, Cin)

    # Single 1x1-conv matmul on the pooled activations (MXU), then the 1/4 avg scale.
    m = pooled.reshape(R * Wh, pooled.shape[-1])
    y = jnp.dot(m.astype(wc_ref.dtype), wc_ref[...],
                preferred_element_type=jnp.float32)          # (R*W//2, Cout)
    o_ref[0] = (0.25 * y).reshape(R, Wh, -1).astype(o_ref.dtype)


@jax.jit
def transition_layer(x_nchw, gamma, beta, conv_w, eps=1e-5):
    """x_nchw: (N, C, H, W) f32; gamma/beta: (C,); conv_w: (Cout, C, 1, 1)."""
    N, C, H, W = x_nchw.shape
    Cout = conv_w.shape[0]
    assert H % 2 == 0 and W % 2 == 0
    Hh, Wh = H // 2, W // 2

    x = x_nchw.astype(jnp.float32)

    # Training-mode BatchNorm statistics (biased variance), folded into scale/bias.
    mean = jnp.mean(x, axis=(0, 2, 3))
    var = jnp.var(x, axis=(0, 2, 3))
    inv_std = jax.lax.rsqrt(var + eps)
    scale = gamma.astype(jnp.float32) * inv_std
    bias = beta.astype(jnp.float32) - mean * scale
    sb = jnp.stack([scale, bias], axis=0)                   # (2, C)

    # 1x1 conv weight, transposed.  Keep f32 so the result matches the f32 reference;
    # cast to bf16 here for the fast MXU path on large models.
    wc = conv_w[:, :, 0, 0].T.astype(jnp.float32)           # (C, Cout)

    # Rearrange NCHW -> (N, 4, Hh, Wh, C): group k = 2*dh + dw holds x[n, c, 2i+dh, 2j+dw].
    # This is one fused transpose-copy in XLA (also covers the NCHW->NHWC conversion).
    xg = x.reshape(N, C, Hh, 2, Wh, 2)
    xg = jnp.transpose(xg, (0, 3, 5, 2, 4, 1))              # (N, 2, 2, Hh, Wh, C)
    xg = xg.reshape(N, 4, Hh, Wh, C)

    # Generation-safe tile sizing: R output rows per grid step, input tile capped so
    # double-buffered operands fit comfortably in v7x's 64 MiB VMEM (and v5e/v6e's 128).
    tile_budget_bytes = 4 * 1024 * 1024          # per input tile (x2 for double-buffer)
    bytes_per_out_row = 2 * W * C * 4            # two f32 input rows per output row
    r_cap = max(1, tile_budget_bytes // bytes_per_out_row)
    if N == 1 and Hh >= 2:
        # keep >= 2 grid steps so both v7x TensorCores get work
        r_cap = min(r_cap, max(1, Hh // 2))
    r_cap = min(r_cap, Hh)
    R = 1
    for d in range(1, Hh + 1):                   # largest divisor of Hh <= r_cap
        if Hh % d == 0 and d <= r_cap:
            R = d
    G = Hh // R

    out = pl.pallas_call(
        transition_kernel,
        out_shape=jax.ShapeDtypeStruct((N, Hh, Wh, Cout), jnp.float32),
        grid=(N, G),
        in_specs=[
            pl.BlockSpec((1, 4, R, Wh, C), lambda n, g: (n, 0, g, 0, 0)),
            pl.BlockSpec((2, C), lambda n, g: (0, 0)),
            pl.BlockSpec((C, Cout), lambda n, g: (0, 0)),
        ],
        out_specs=pl.BlockSpec((1, R, Wh, Cout), lambda n, g: (n, g, 0, 0)),
        compiler_params=pltpu.CompilerParams(
            dimension_semantics=("parallel", "parallel"),
            vmem_limit_bytes=48 * 1024 * 1024,
        ),
    )(xg, sb, wc)

    # TODO(synk): drop this transpose (and accept NHWC) if the downstream consumer
    # allows it; it is a full extra HBM read+write.
    return jnp.transpose(out, (0, 3, 1, 2))      # back to NCHW


def transition_layer_ref(x, gamma, beta, conv_w, eps=1e-5):
    """Pure-JAX reference of the PyTorch forward (NCHW, training-mode BN)."""
    N, C, H, W = x.shape
    mean = jnp.mean(x, axis=(0, 2, 3), keepdims=True)
    var = jnp.var(x, axis=(0, 2, 3), keepdims=True)
    xn = (x - mean) / jnp.sqrt(var + eps)
    xn = xn * gamma.reshape(1, C, 1, 1) + beta.reshape(1, C, 1, 1)
    a = jnp.maximum(xn, 0.0)
    y = jnp.einsum('nchw,oc->nohw', a, conv_w[:, :, 0, 0])
    y = y.reshape(N, -1, H // 2, 2, W // 2, 2).mean(axis=(3, 5))
    return y


if __name__ == "__main__":
    key = jax.random.PRNGKey(0)
    k_x, k_g, k_b, k_w = jax.random.split(key, 4)

    N, C, H, W = 2, 4, 16, 16          # inplanes = 4 -> outplanes = 2
    Cout = C // 2

    x = jax.random.normal(k_x, (N, C, H, W), dtype=jnp.float32)
    gamma = 0.5 + jax.random.uniform(k_g, (C,), dtype=jnp.float32)       # BN weight
    beta = 0.1 * jax.random.normal(k_b, (C,), dtype=jnp.float32)         # BN bias
    conv_w = 0.1 * jax.random.normal(k_w, (Cout, C, 1, 1), dtype=jnp.float32)

    out = transition_layer(x, gamma, beta, conv_w)
    out = jax.block_until_ready(out)

    ref = transition_layer_ref(x, gamma, beta, conv_w)
    assert out.shape == (N, Cout, H // 2, W // 2), out.shape
    assert jnp.allclose(out, ref, atol=1e-5, rtol=1e-5), float(jnp.max(jnp.abs(out - ref)))

    print("KERNEL_OK")
</pallas_src>

<mosaic_0001>
module attributes {stable_mosaic.version = 11 : i64} {
  func.func @transition_kernel(%arg0: i32, %arg1: i32, %arg2: memref<1x4x8x8x4xf32, #tpu.memory_space<vmem>>, %arg3: memref<2x4xf32, #tpu.memory_space<vmem>>, %arg4: memref<4x2xf32, #tpu.memory_space<vmem>>, %arg5: memref<1x8x8x2xf32, #tpu.memory_space<vmem>>) attributes {dimension_semantics = [#tpu.dimension_semantics<parallel>, #tpu.dimension_semantics<parallel>], iteration_bounds = array<i64: 2, 1>, scalar_prefetch = 0 : i64, scratch_operands = 0 : i64, tpu.core_type = #tpu.core_type<tc>, window_params = [{transform_indices = @transform_0, window_bounds = array<i64: 1, 4, 8, 8, 4>}, {pipeline_mode = #tpu.pipeline_mode<synchronous>, transform_indices = @transform_1, window_bounds = array<i64: 2, 4>}, {pipeline_mode = #tpu.pipeline_mode<synchronous>, transform_indices = @transform_2, window_bounds = array<i64: 4, 2>}, {transform_indices = @transform_3, window_bounds = array<i64: 1, 8, 8, 2>}]} {
    %c0 = arith.constant 0 : index
    %c0_0 = arith.constant 0 : index
    %0 = vector.load %arg3[%c0, %c0_0] : memref<2x4xf32, #tpu.memory_space<vmem>>, vector<1x4xf32>
    %c1 = arith.constant 1 : index
    %c0_1 = arith.constant 0 : index
    %1 = vector.load %arg3[%c1, %c0_1] : memref<2x4xf32, #tpu.memory_space<vmem>>, vector<1x4xf32>
    %c0_2 = arith.constant 0 : index
    %c0_3 = arith.constant 0 : index
    %c0_4 = arith.constant 0 : index
    %c0_5 = arith.constant 0 : index
    %c0_6 = arith.constant 0 : index
    %2 = vector.load %arg2[%c0_2, %c0_3, %c0_4, %c0_5, %c0_6] : memref<1x4x8x8x4xf32, #tpu.memory_space<vmem>>, vector<1x4x8x8x4xf32>
    %3 = vector.extract_strided_slice %2 {offsets = [0, 0, 0, 0, 0], sizes = [1, 1, 8, 8, 4], strides = [1, 1, 1, 1, 1]} : vector<1x4x8x8x4xf32> to vector<1x1x8x8x4xf32>
    %4 = vector.shape_cast %3 : vector<1x1x8x8x4xf32> to vector<8x8x4xf32>
    %5 = vector.shape_cast %0 : vector<1x4xf32> to vector<1x1x4xf32>
    %6 = vector.broadcast %5 : vector<1x1x4xf32> to vector<8x8x4xf32>
    %7 = arith.mulf %4, %6 : vector<8x8x4xf32>
    %8 = vector.shape_cast %1 : vector<1x4xf32> to vector<1x1x4xf32>
    %9 = vector.broadcast %8 : vector<1x1x4xf32> to vector<8x8x4xf32>
    %10 = arith.addf %7, %9 : vector<8x8x4xf32>
    %cst = arith.constant 0.000000e+00 : f32
    %11 = vector.broadcast %cst : f32 to vector<8x8x4xf32>
    %12 = arith.maximumf %10, %11 : vector<8x8x4xf32>
    %13 = vector.extract_strided_slice %2 {offsets = [0, 1, 0, 0, 0], sizes = [1, 1, 8, 8, 4], strides = [1, 1, 1, 1, 1]} : vector<1x4x8x8x4xf32> to vector<1x1x8x8x4xf32>
    %14 = vector.shape_cast %13 : vector<1x1x8x8x4xf32> to vector<8x8x4xf32>
    %15 = vector.shape_cast %0 : vector<1x4xf32> to vector<1x1x4xf32>
    %16 = vector.broadcast %15 : vector<1x1x4xf32> to vector<8x8x4xf32>
    %17 = arith.mulf %14, %16 : vector<8x8x4xf32>
    %18 = vector.shape_cast %1 : vector<1x4xf32> to vector<1x1x4xf32>
    %19 = vector.broadcast %18 : vector<1x1x4xf32> to vector<8x8x4xf32>
    %20 = arith.addf %17, %19 : vector<8x8x4xf32>
    %cst_7 = arith.constant 0.000000e+00 : f32
    %21 = vector.broadcast %cst_7 : f32 to vector<8x8x4xf32>
    %22 = arith.maximumf %20, %21 : vector<8x8x4xf32>
    %23 = arith.addf %12, %22 : vector<8x8x4xf32>
    %24 = vector.extract_strided_slice %2 {offsets = [0, 2, 0, 0, 0], sizes = [1, 1, 8, 8, 4], strides = [1, 1, 1, 1, 1]} : vector<1x4x8x8x4xf32> to vector<1x1x8x8x4xf32>
    %25 = vector.shape_cast %24 : vector<1x1x8x8x4xf32> to vector<8x8x4xf32>
    %26 = vector.shape_cast %0 : vector<1x4xf32> to vector<1x1x4xf32>
    %27 = vector.broadcast %26 : vector<1x1x4xf32> to vector<8x8x4xf32>
    %28 = arith.mulf %25, %27 : vector<8x8x4xf32>
    %29 = vector.shape_cast %1 : vector<1x4xf32> to vector<1x1x4xf32>
    %30 = vector.broadcast %29 : vector<1x1x4xf32> to vector<8x8x4xf32>
    %31 = arith.addf %28, %30 : vector<8x8x4xf32>
    %cst_8 = arith.constant 0.000000e+00 : f32
    %32 = vector.broadcast %cst_8 : f32 to vector<8x8x4xf32>
    %33 = arith.maximumf %31, %32 : vector<8x8x4xf32>
    %34 = arith.addf %23, %33 : vector<8x8x4xf32>
    %35 = vector.extract_strided_slice %2 {offsets = [0, 3, 0, 0, 0], sizes = [1, 1, 8, 8, 4], strides = [1, 1, 1, 1, 1]} : vector<1x4x8x8x4xf32> to vector<1x1x8x8x4xf32>
    %36 = vector.shape_cast %35 : vector<1x1x8x8x4xf32> to vector<8x8x4xf32>
    %37 = vector.shape_cast %0 : vector<1x4xf32> to vector<1x1x4xf32>
    %38 = vector.broadcast %37 : vector<1x1x4xf32> to vector<8x8x4xf32>
    %39 = arith.mulf %36, %38 : vector<8x8x4xf32>
    %40 = vector.shape_cast %1 : vector<1x4xf32> to vector<1x1x4xf32>
    %41 = vector.broadcast %40 : vector<1x1x4xf32> to vector<8x8x4xf32>
    %42 = arith.addf %39, %41 : vector<8x8x4xf32>
    %cst_9 = arith.constant 0.000000e+00 : f32
    %43 = vector.broadcast %cst_9 : f32 to vector<8x8x4xf32>
    %44 = arith.maximumf %42, %43 : vector<8x8x4xf32>
    %45 = arith.addf %34, %44 : vector<8x8x4xf32>
    %46 = vector.shape_cast %45 : vector<8x8x4xf32> to vector<64x4xf32>
    %c0_10 = arith.constant 0 : index
    %c0_11 = arith.constant 0 : index
    %47 = vector.load %arg4[%c0_10, %c0_11] : memref<4x2xf32, #tpu.memory_space<vmem>>, vector<4x2xf32>
    %cst_12 = arith.constant dense<0.000000e+00> : vector<64x2xf32>
    %48 = tpu.matmul %46, %47, %cst_12 {dimension_numbers = #tpu.dot_dimension_numbers<[1], [0], [0], [1], [0, 0, 1, 1], [], []>} : vector<64x4xf32>, vector<4x2xf32>, vector<64x2xf32> -> vector<64x2xf32>
    %cst_13 = arith.constant 2.500000e-01 : f32
    %49 = vector.broadcast %cst_13 : f32 to vector<64x2xf32>
    %50 = arith.mulf %49, %48 : vector<64x2xf32>
    %51 = vector.shape_cast %50 : vector<64x2xf32> to vector<8x8x2xf32>
    %c0_14 = arith.constant 0 : index
    %c0_15 = arith.constant 0 : index
    %c0_16 = arith.constant 0 : index
    %c0_17 = arith.constant 0 : index
    %52 = vector.load %arg5[%c0_14, %c0_15, %c0_16, %c0_17] : memref<1x8x8x2xf32, #tpu.memory_space<vmem>>, vector<1x8x8x2xf32>
    %53 = vector.shape_cast %52 : vector<1x8x8x2xf32> to vector<8x8x2xf32>
    %54 = vector.shape_cast %51 : vector<8x8x2xf32> to vector<1x8x8x2xf32>
    tpu.vector_store %arg5[%c0_14, %c0_15, %c0_16, %c0_17], %54 {strides = array<i32>} : memref<1x8x8x2xf32, #tpu.memory_space<vmem>>, vector<1x8x8x2xf32>,
    return
  }
  func.func @transform_0(%arg0: i32, %arg1: i32) -> (i32, i32, i32, i32, i32) {
    %c0_i32 = arith.constant 0 : i32
    %c0_i32_0 = arith.constant 0 : i32
    %c0_i32_1 = arith.constant 0 : i32
    %c0_i32_2 = arith.constant 0 : i32
    return %arg0, %c0_i32, %arg1, %c0_i32_0, %c0_i32_1 : i32, i32, i32, i32, i32
  }
  func.func @transform_1(%arg0: i32, %arg1: i32) -> (i32, i32) {
    %c0_i32 = arith.constant 0 : i32
    %c0_i32_0 = arith.constant 0 : i32
    %c0_i32_1 = arith.constant 0 : i32
    return %c0_i32, %c0_i32_0 : i32, i32
  }
  func.func @transform_2(%arg0: i32, %arg1: i32) -> (i32, i32) {
    %c0_i32 = arith.constant 0 : i32
    %c0_i32_0 = arith.constant 0 : i32
    %c0_i32_1 = arith.constant 0 : i32
    return %c0_i32, %c0_i32_0 : i32, i32
  }
  func.func @transform_3(%arg0: i32, %arg1: i32) -> (i32, i32, i32, i32) {
    %c0_i32 = arith.constant 0 : i32
    %c0_i32_0 = arith.constant 0 : i32
    %c0_i32_1 = arith.constant 0 : i32
    return %arg0, %arg1, %c0_i32, %c0_i32_0 : i32, i32, i32, i32
  }
}

</mosaic_0001>

<bundles_post_ra>
// kernel: transition_layer.1
= control target key start
LH: loop header
LB: loop body
LE: loop exit
PB: predicated region body
PF: predicated region fallthrough
CT: control target
= control target key end

     0   :  { %s728_s12 = smov 0   ;;  %s730_s13 = smov 0   ;;  %s892_s0 = inlined_call_operand.vmem [shape: f32[2,4,8,8,4], index: 0, kind: input, shape index: {}]   ;;  %s893_s1 = inlined_call_operand.vmem [shape: f32[2,4], index: 1, kind: input, shape index: {}]   ;;  %s894_s2 = inlined_call_operand.vmem [shape: f32[4,2], index: 2, kind: input, shape index: {}]   ;;  %s895_s3 = inlined_call_operand.vmem [shape: f32[2,8,8,2], index: 3, kind: output, shape index: {}]  }
   0x1   :  { %s732_s14 = smov 0  }
   0x2 LB: > { %s25_s15 = sadd.s32 1, %s702_s13  ;;  %p615_p0 = scmp.ge.s32.totalorder %s706_s14, 1  ;;  %s706_s14 = sphi %s732_s14, %s13_s14   ;;  %s702_s13 = sphi %s730_s13, %s897_s13   ;;  %s698_s12 = sphi %s728_s12, %s896_s12  }
   0x3   : > { %p27_p1 = scmp.ge.s32.totalorder %s25_s15, 2  ;;  %p158_p2 = scmp.lt.s32.totalorder %s706_s14, 3 }
   0x5   : > { %s899_s15 = smov (%p27_p1, %s25_s15), 0  ;;  %p159_p3 = pnand %p615_p0, %p158_p2 }
   0x6   : > { %v372_v0 = vld [vmem:[%s894_s2] sm:$0xf] (!%p159_p3)  ;;  %vm398_vm0 = vcmask (!%p159_p3), 1043456   ;;  %p191_p4 = scmp.lt.s32.totalorder (!%p159_p3), %s698_s12, 1  ;;  %vm373_vm1 = vcmask (!%p159_p3), 31744   ;;  %vm515_vm2 = vcmask (!%p159_p3), 15360  }
   0x7   : > { %162 = sbr.rel (%p159_p3) target bundleno = 271 (0x10f), region = 32  ;;  %644 = vmatprep.subr.msk.mxu0 (!%p159_p3), %vm398_vm0, %v372_v0  ;;  %658 = vmatprep.subr.msk.mxu1 (!%p159_p3), %vm398_vm0, %v372_v0  ;;  %v755_v1 = vld [vmem:[%s893_s1] ss:$0 sm:$0xff] (!%p159_p3)  ;;  %v765_v2 = vld [vmem:[%s893_s1 + $0x1] ss:$0 sm:$0xff] (!%p159_p3) }
   0x8   : > { %645 = vmatpush3.msk.msra.mxu0 (!%p159_p3), %vm398_vm0, %v372_v0  ;;  %659 = vmatpush3.msk.msra.mxu1 (!%p159_p3), %vm398_vm0, %v372_v0 }
   0xe   : > { %s901_s12 = smov (!%p191_p4, %s698_s12), 1 }
   0xf   : > { %s633_s18 = sshll.u32 %s901_s12, 8  ;;  %s634_s26 = sshll.u32 %s901_s12, 6 }
  0x10   : > { %s760_s23 = scalar_lea.vmem %s892_s0, %s633_s18  ;;  %s208_s29 = scalar_lea.vmem %s895_s3, %s634_s26 }
  0x11   : > { %v212_v3 = vld [vmem:[%s760_s23] sm:$0xff]  ;;  %v213_v25 = vld [vmem:[%s760_s23 + $0x8] sm:$0xff]  ;;  %v214_v61 = vld [vmem:[%s760_s23 + $0x10] sm:$0xff] }
  0x12   : > { %v220_v4 = vld [vmem:[%s760_s23 + $0x40] sm:$0xff]  ;;  %v248_v7 = vmul.f32 %v755_v1, %v212_v3  ;;  %v221_v26 = vld [vmem:[%s760_s23 + $0x48] sm:$0xff]  ;;  %v249_v40 = vmul.f32 %v755_v1, %v213_v25  ;;  %v222_v62 = vld [vmem:[%s760_s23 + $0x50] sm:$0xff] }
  0x13   : > { %v228_v5 = vld [vmem:[%s760_s23 + $0x80] sm:$0xff]  ;;  %v276_v8 = vmul.f32 %v755_v1, %v220_v4  ;;  %v229_v31 = vld [vmem:[%s760_s23 + $0x88] sm:$0xff]  ;;  %v277_v41 = vmul.f32 %v755_v1, %v221_v26  ;;  %v230_v63 = vld [vmem:[%s760_s23 + $0x90] sm:$0xff] }
  0x14   : > { %v236_v6 = vld [vmem:[%s760_s23 + $0xc0] sm:$0xff]  ;;  %v308_v9 = vmul.f32 %v755_v1, %v228_v5  ;;  %v260_v17 = vadd.f32 %v765_v2, %v248_v7  ;;  %v237_v32 = vld [vmem:[%s760_s23 + $0xc8] sm:$0xff]  ;;  %v309_v45 = vmul.f32 %v755_v1, %v229_v31  ;;  %v261_v48 = vadd.f32 %v765_v2, %v249_v40  ;;  %v234_v25 = vld [vmem:[%s760_s23 + $0xb0] sm:$0xff] }
  0x15   : > { %v216_v10 = vld [vmem:[%s760_s23 + $0x20] sm:$0xff]  ;;  %v340_v12 = vmul.f32 %v755_v1, %v236_v6  ;;  %v284_v18 = vadd.f32 %v765_v2, %v276_v8  ;;  %v217_v37 = vld [vmem:[%s760_s23 + $0x28] sm:$0xff]  ;;  %v341_v46 = vmul.f32 %v755_v1, %v237_v32  ;;  %v285_v49 = vadd.f32 %v765_v2, %v277_v41  ;;  %v238_v6 = vld [vmem:[%s760_s23 + $0xd0] sm:$0xff] }
  0x16   : > { %v224_v11 = vld [vmem:[%s760_s23 + $0x60] sm:$0xff]  ;;  %v252_v15 = vmul.f32 %v755_v1, %v216_v10  ;;  %v316_v19 = vadd.f32 %v765_v2, %v308_v9  ;;  %v268_v27 = vmax.f32 %v260_v17, 0.0  ;;  %v225_v42 = vld [vmem:[%s760_s23 + $0x68] sm:$0xff]  ;;  %v253_v50 = vmul.f32 %v755_v1, %v217_v37  ;;  %v215_v31 = vld [vmem:[%s760_s23 + $0x18] sm:$0xff] }
  0x17   : > { %v232_v13 = vld [vmem:[%s760_s23 + $0xa0] sm:$0xff]  ;;  %v280_v16 = vmul.f32 %v755_v1, %v224_v11  ;;  %v348_v21 = vadd.f32 %v765_v2, %v340_v12  ;;  %v292_v28 = vmax.f32 %v284_v18, 0.0  ;;  %v317_v52 = vadd.f32 %v765_v2, %v309_v45  ;;  %v233_v54 = vld [vmem:[%s760_s23 + $0xa8] sm:$0xff] }
  0x18   : > { %v240_v14 = vld [vmem:[%s760_s23 + $0xe0] sm:$0xff]  ;;  %v312_v20 = vmul.f32 %v755_v1, %v232_v13  ;;  %v264_v22 = vadd.f32 %v765_v2, %v252_v15  ;;  %v324_v29 = vmax.f32 %v316_v19, 0.0  ;;  %v349_v53 = vadd.f32 %v765_v2, %v341_v46  ;;  %v241_v55 = vld [vmem:[%s760_s23 + $0xe8] sm:$0xff]  ;;  %v218_v19 = vld [vmem:[%s760_s23 + $0x30] sm:$0xff] }
  0x19   : > { %v288_v23 = vadd.f32 %v765_v2, %v280_v16  ;;  %v344_v24 = vmul.f32 %v755_v1, %v240_v14  ;;  %v356_v33 = vmax.f32 %v348_v21, 0.0  ;;  %v300_v38 = vadd.f32 %v292_v28, %v268_v27 }
  0x1a   : > { %v320_v30 = vadd.f32 %v765_v2, %v312_v20  ;;  %v272_v34 = vmax.f32 %v264_v22, 0.0  ;;  %v281_v56 = vmul.f32 %v755_v1, %v225_v42  ;;  %v269_v58 = vmax.f32 %v261_v48, 0.0 }
  0x1b   : > { %v296_v35 = vmax.f32 %v288_v23, 0.0  ;;  %v352_v36 = vadd.f32 %v765_v2, %v344_v24  ;;  %v332_v47 = vadd.f32 %v324_v29, %v300_v38  ;;  %v293_v59 = vmax.f32 %v285_v49, 0.0  ;;  %v226_v24 = vld [vmem:[%s760_s23 + $0x70] sm:$0xff]  ;;  %v239_v49 = vld [vmem:[%s760_s23 + $0xd8] sm:$0xff] }
  0x1c   : > { %v328_v39 = vmax.f32 %v320_v30, 0.0  ;;  %v265_v60 = vadd.f32 %v765_v2, %v253_v50  ;;  %v325_v3 = vmax.f32 %v317_v52, 0.0  ;;  %v357_v4 = vmax.f32 %v349_v53, 0.0  ;;  %v242_v30 = vld [vmem:[%s760_s23 + $0xf0] sm:$0xff] }
  0x1d   : > { %v304_v43 = vadd.f32 %v296_v35, %v272_v34  ;;  %v360_v44 = vmax.f32 %v352_v36, 0.0  ;;  %v364_v57 = vadd.f32 %v356_v33, %v332_v47  ;;  %v289_v5 = vadd.f32 %v765_v2, %v281_v56  ;;  %v223_v36 = vld [vmem:[%s760_s23 + $0x58] sm:$0xff] }
  0x1e   : > { %v301_v7 = vadd.f32 %v293_v59, %v269_v58  ;;  %v273_v8 = vmax.f32 %v265_v60, 0.0  ;;  %v313_v9 = vmul.f32 %v755_v1, %v233_v54  ;;  %v345_v10 = vmul.f32 %v755_v1, %v241_v55  ;;  %v219_v55 = vld [vmem:[%s760_s23 + $0x38] sm:$0xff] }
  0x1f   : > { %v336_v51 = vadd.f32 %v328_v39, %v304_v43  ;;  %646 = vmatprep.mubr.msk.f32.mxu0 %vm373_vm1, %v364_v57  ;;  %v297_v11 = vmax.f32 %v289_v5, 0.0  ;;  %v250_v12 = vmul.f32 %v755_v1, %v214_v61  ;;  %v278_v13 = vmul.f32 %v755_v1, %v222_v62  ;;  %v227_v60 = vld [vmem:[%s760_s23 + $0x78] sm:$0xff] }
  0x20   : > { %v310_v14 = vmul.f32 %v755_v1, %v230_v63  ;;  %v333_v15 = vadd.f32 %v325_v3, %v301_v7  ;;  %v321_v16 = vadd.f32 %v765_v2, %v313_v9  ;;  %v353_v17 = vadd.f32 %v765_v2, %v345_v10  ;;  %v235_v61 = vld [vmem:[%s760_s23 + $0xb8] sm:$0xff] }
  0x21   : > { %v368_v0 = vadd.f32 %v360_v44, %v336_v51  ;;  %v342_v18 = vmul.f32 %v755_v1, %v238_v6  ;;  %v305_v20 = vadd.f32 %v297_v11, %v273_v8  ;;  %v262_v21 = vadd.f32 %v765_v2, %v250_v12  ;;  %v231_v44 = vld [vmem:[%s760_s23 + $0x98] sm:$0xff] }
  0x22   : > { %v286_v22 = vadd.f32 %v765_v2, %v278_v13  ;;  %v318_v23 = vadd.f32 %v765_v2, %v310_v14  ;;  %v365_v26 = vadd.f32 %v357_v4, %v333_v15  ;;  %v329_v27 = vmax.f32 %v321_v16, 0.0  ;;  %v243_v62 = vld [vmem:[%s760_s23 + $0xf8] sm:$0xff] }
  0x23   : > { %652 = vmatprep.mubr.msk.f32.mxu1 %vm373_vm1, %v368_v0  ;;  %v361_v28 = vmax.f32 %v353_v17, 0.0  ;;  %v350_v29 = vadd.f32 %v765_v2, %v342_v18  ;;  %v270_v32 = vmax.f32 %v262_v21, 0.0  ;;  %v254_v35 = vmul.f32 %v755_v1, %v218_v19 }
  0x24   : > { %v294_v33 = vmax.f32 %v286_v22, 0.0  ;;  %v326_v34 = vmax.f32 %v318_v23, 0.0  ;;  %647 = vmatmul.mubr.msk.f32.vlgmr.msra.gmra.mrb[0].mxu0 %vm373_vm1, %v365_v26  ;;  %v337_v37 = vadd.f32 %v329_v27, %v305_v20  ;;  %v282_v39 = vmul.f32 %v755_v1, %v226_v24 }
  0x25   : > { %v358_v38 = vmax.f32 %v350_v29, 0.0  ;;  %v314_v40 = vmul.f32 %v755_v1, %v234_v25  ;;  %v266_v42 = vadd.f32 %v765_v2, %v254_v35  ;;  %v346_v43 = vmul.f32 %v755_v1, %v242_v30 }
  0x26   : > { %v302_v41 = vadd.f32 %v294_v33, %v270_v32  ;;  %v251_v45 = vmul.f32 %v755_v1, %v215_v31  ;;  %v369_v46 = vadd.f32 %v361_v28, %v337_v37  ;;  %v290_v47 = vadd.f32 %v765_v2, %v282_v39 }
  0x27   : > { %v322_v48 = vadd.f32 %v765_v2, %v314_v40  ;;  %v279_v50 = vmul.f32 %v755_v1, %v223_v36  ;;  %v274_v52 = vmax.f32 %v266_v42, 0.0  ;;  %v354_v53 = vadd.f32 %v765_v2, %v346_v43 }
  0x28   : > { %v334_v51 = vadd.f32 %v326_v34, %v302_v41  ;;  %v263_v54 = vadd.f32 %v765_v2, %v251_v45  ;;  %653 = vmatmul.mubr.msk.f32.vlgmr.msra.gmra.mrb[0].mxu1 %vm373_vm1, %v369_v46  ;;  %v298_v56 = vmax.f32 %v290_v47, 0.0  ;;  %v311_v59 = vmul.f32 %v755_v1, %v231_v44 }
  0x29   : > { %v330_v57 = vmax.f32 %v322_v48, 0.0  ;;  %v287_v58 = vadd.f32 %v765_v2, %v279_v50  ;;  %v362_v0 = vmax.f32 %v354_v53, 0.0  ;;  %v343_v4 = vmul.f32 %v755_v1, %v239_v49 }
  0x2a   : > { %v366_v63 = vadd.f32 %v358_v38, %v334_v51  ;;  %v271_v3 = vmax.f32 %v263_v54, 0.0  ;;  %v306_v5 = vadd.f32 %v298_v56, %v274_v52  ;;  %v319_v7 = vadd.f32 %v765_v2, %v311_v59 }
  0x2b   : > { %v295_v6 = vmax.f32 %v287_v58, 0.0  ;;  %v255_v8 = vmul.f32 %v755_v1, %v219_v55  ;;  %v351_v9 = vadd.f32 %v765_v2, %v343_v4  ;;  %v283_v10 = vmul.f32 %v755_v1, %v227_v60 }
  0x2c   : > { %649 = vmatprep.mubr.msk.f32.mxu0 %vm373_vm1, %v366_v63  ;;  %v315_v11 = vmul.f32 %v755_v1, %v235_v61  ;;  %v347_v12 = vmul.f32 %v755_v1, %v243_v62  ;;  %v338_v13 = vadd.f32 %v330_v57, %v306_v5  ;;  %v327_v15 = vmax.f32 %v319_v7, 0.0 }
  0x2d   : > { %v303_v14 = vadd.f32 %v295_v6, %v271_v3  ;;  %v267_v16 = vadd.f32 %v765_v2, %v255_v8  ;;  %v359_v17 = vmax.f32 %v351_v9, 0.0  ;;  %v291_v18 = vadd.f32 %v765_v2, %v283_v10 }
  0x2e   : > { %v323_v19 = vadd.f32 %v765_v2, %v315_v11  ;;  %v355_v20 = vadd.f32 %v765_v2, %v347_v12  ;;  %v370_v21 = vadd.f32 %v362_v0, %v338_v13 }
  0x2f   : > { %v335_v22 = vadd.f32 %v327_v15, %v303_v14  ;;  %v275_v23 = vmax.f32 %v267_v16, 0.0  ;;  %v299_v24 = vmax.f32 %v291_v18, 0.0 }
  0x30   : > { %v331_v25 = vmax.f32 %v323_v19, 0.0  ;;  %655 = vmatprep.mubr.msk.f32.mxu1 %vm373_vm1, %v370_v21  ;;  %v363_v27 = vmax.f32 %v355_v20, 0.0 }
  0x31   : > { %v367_v1 = vadd.f32 %v359_v17, %v335_v22  ;;  %v307_v26 = vadd.f32 %v299_v24, %v275_v23 }
  0x33   : > { %650 = vmatmul.mubr.msk.f32.gmra.mrb[2].mxu0 %vm373_vm1, %v367_v1  ;;  %v339_v28 = vadd.f32 %v331_v25, %v307_v26 }
  0x35   : > { %v371_v29 = vadd.f32 %v363_v27, %v339_v28 }
  0x37   : > { %656 = vmatmul.mubr.msk.f32.gmra.mrb[2].mxu1 %vm373_vm1, %v371_v29 }
  0xf7   : > { %v648_v2 = vpop.f32.mrb[0].mxu0 }
  0xf8   : > { %v508_v30 = vmul.f32 0.25, %v648_v2  ;;  %v468_v31 = vpop.f32.mrb[1].mxu0 }
  0xf9   : > { %v507_v32 = vmul.f32 0.25, %v468_v31 }
  0xfa   : > { %517 = vst.msk [vmem:[%s208_s29 + $0x8] sm:$0xff] %vm515_vm2, %v508_v30 }
  0xfb   : > { %v654_v33 = vpop.f32.mrb[0].mxu1  ;;  %516 = vst.msk [vmem:[%s208_s29] sm:$0xff] %vm515_vm2, %v507_v32 }
  0xfc   : > { %v512_v34 = vmul.f32 0.25, %v654_v33  ;;  %v488_v35 = vpop.f32.mrb[1].mxu1 }
  0xfd   : > { %v511_v36 = vmul.f32 0.25, %v488_v35 }
  0xfe   : > { %521 = vst.msk [vmem:[%s208_s29 + $0x28] sm:$0xff] %vm515_vm2, %v512_v34 }
  0xff   : > { %520 = vst.msk [vmem:[%s208_s29 + $0x20] sm:$0xff] %vm515_vm2, %v511_v36 }
 0x106   : > { %v651_v37 = vpop.f32.mrb[2].mxu0 }
 0x107   : > { %v510_v38 = vmul.f32 0.25, %v651_v37  ;;  %v478_v39 = vpop.f32.mrb[3].mxu0 }
 0x108   : > { %v509_v40 = vmul.f32 0.25, %v478_v39 }
 0x109   : > { %519 = vst.msk [vmem:[%s208_s29 + $0x18] sm:$0xff] %vm515_vm2, %v510_v38 }
 0x10a   : > { %518 = vst.msk [vmem:[%s208_s29 + $0x10] sm:$0xff] %vm515_vm2, %v509_v40  ;;  %v657_v41 = vpop.f32.mrb[2].mxu1 }
 0x10b   : > { %v514_v42 = vmul.f32 0.25, %v657_v41  ;;  %v498_v43 = vpop.f32.mrb[3].mxu1 }
 0x10c   : > { %v513_v44 = vmul.f32 0.25, %v498_v43 }
 0x10d   : > { %523 = vst.msk [vmem:[%s208_s29 + $0x38] sm:$0xff] %vm515_vm2, %v514_v42 }
 0x10e   : > { %522 = vst.msk [vmem:[%s208_s29 + $0x30] sm:$0xff] %vm515_vm2, %v513_v44 }
 0x10f PF: > { %s13_s14 = sadd.s32 1, %s706_s14   ;;  %s896_s12 = smov %s702_s13 }
 0x110   : > { %p10_p5 = scmp.ge.s32.totalorder %s13_s14, 4   ;;  %s897_s13 = smov %s899_s15 }
 0x112   :  { %12 = sbr.rel (!%p10_p5) target bundleno = 2 (0x2), region = 62 }

</bundles_post_ra>
